<compile_context>
chip_gen: v7x
topology: tpu7x:2x2x1
jax: 0.10.0
libtpu: 0.0.40
codegen_flags: <defaults>
</compile_context>

<pallas_src>
import jax
import jax.numpy as jnp
from jax.experimental import pallas as pl
from jax.experimental.pallas import tpu as pltpu


def _outconv_kernel(x_ref, w_ref, b_ref, o_ref):
    # x_ref: (NB, C_in, TP)   w_ref: (C_out, C_in)   b_ref: (C_out, 1)
    # o_ref: (NB, C_out, TP)
    x = x_ref[...]           # (NB, C_in, TP)   spatial on lanes (dense)
    w = w_ref[...]           # (C_out, C_in)
    b = b_ref[...]           # (C_out, 1)

    c_in = x.shape[1]
    if c_in <= 8:
        # VPU path: a handful of broadcast FMAs per vreg; keeps the MXU idle
        # (it would be nearly empty anyway with K=C_in this small).
        acc = b[None] + w[None, :, 0:1] * x[:, 0:1, :]          # (NB, C_out, TP)
        for c in range(1, c_in):
            acc = acc + w[None, :, c:c + 1] * x[:, c:c + 1, :]
    else:
        # Wide-channel fallback: MXU. Keep operand dtype (bf16 stays bf16),
        # accumulate in f32.
        acc = jnp.einsum("oc,ncp->nop", w, x,
                         preferred_element_type=jnp.float32) + b[None]

    o_ref[...] = acc.astype(o_ref.dtype)


def _round_up(a, b):
    return ((a + b - 1) // b) * b


def _largest_divisor_le(n, cap):
    cap = max(1, min(n, cap))
    for d in range(cap, 0, -1):
        if n % d == 0:
            return d
    return 1


def outconv_pallas(x_nchw, weight, bias, *, tp_max=128 * 1024):
    """1x1 Conv2d forward (OutConv).

    x_nchw: (N, C_in, H, W)
    weight: (C_out, C_in, 1, 1)   (PyTorch Conv2d weight layout)
    bias:   (C_out,)
    returns (N, C_out, H, W)
    """
    N, C_in, H, W = x_nchw.shape
    C_out = weight.shape[0]
    Mhw = H * W
    itemsize = jnp.dtype(x_nchw.dtype).itemsize

    # Free reshapes (HW is contiguous in NCHW): spatial goes on the lane axis.
    x_rows = x_nchw.reshape(N, C_in, Mhw)
    w_mat = weight.reshape(C_out, C_in)
    b_col = bias.reshape(C_out, 1)

    LANE = 128
    # Per-block spatial-element budget: as large as tp_max, but capped so that
    # double-buffered (x + out) blocks (sublane-padded to 8) stay within a
    # 24 MiB pipeline budget — safe on v7x's 64 MiB physical VMEM.
    sub_in = _round_up(C_in, 8)
    sub_out = _round_up(C_out, 8)
    vmem_budget = 24 << 20
    elems = min(tp_max, vmem_budget // (2 * (sub_in + sub_out) * itemsize))
    elems = max(LANE, (elems // LANE) * LANE)

    if Mhw > elems:
        # Tile the spatial axis; trailing partial block is masked by Pallas
        # (no wrapper pad, no output slice).
        tp = elems
        nb = 1
    else:
        # Whole spatial extent in one block (any size == full dim is legal);
        # pack several batch images per block so grid steps are few and fat.
        tp = Mhw
        cap = min(N, max(1, elems // max(tp, 1)))
        if N >= 2:
            cap = min(cap, max(1, N // 2))   # keep >=2 blocks for v7x megacore
        nb = _largest_divisor_le(N, cap)     # divides N -> no partial batch blocks

    grid = (pl.cdiv(N, nb), pl.cdiv(Mhw, tp))

    cost = pl.CostEstimate(
        flops=2 * N * Mhw * C_in * C_out,
        transcendentals=0,
        bytes_accessed=itemsize * (N * Mhw * (C_in + C_out)
                                   + C_in * C_out + C_out),
    )

    out = pl.pallas_call(
        _outconv_kernel,
        out_shape=jax.ShapeDtypeStruct((N, C_out, Mhw), x_nchw.dtype),
        grid_spec=pltpu.PrefetchScalarGridSpec(
            num_scalar_prefetch=0,
            grid=grid,
            in_specs=[
                pl.BlockSpec((nb, C_in, tp), lambda n, s: (n, 0, s)),
                pl.BlockSpec((C_out, C_in), lambda n, s: (0, 0)),   # resident
                pl.BlockSpec((C_out, 1), lambda n, s: (0, 0)),      # resident
            ],
            out_specs=pl.BlockSpec((nb, C_out, tp), lambda n, s: (n, 0, s)),
        ),
        compiler_params=pltpu.CompilerParams(
            dimension_semantics=("parallel", "parallel"),
            vmem_limit_bytes=32 << 20,   # above v5e's 16 MiB default, safe on all gens
        ),
        cost_estimate=cost,
    )(x_rows, w_mat, b_col)

    return out.reshape(N, C_out, H, W)


if __name__ == "__main__":
    key = jax.random.PRNGKey(0)
    k_x, k_w, k_b = jax.random.split(key, 3)

    N, C_in, C_out, H, W = 2, 4, 3, 16, 16

    x = jax.random.normal(k_x, (N, C_in, H, W), dtype=jnp.float32)
    # Deterministic parameter init (shapes match nn.Conv2d(in, out, kernel_size=1))
    weight = jax.random.normal(k_w, (C_out, C_in, 1, 1), dtype=jnp.float32) * 0.1
    bias = jax.random.normal(k_b, (C_out,), dtype=jnp.float32) * 0.1

    y = outconv_pallas(x, weight, bias)
    y = jax.block_until_ready(y)

    # Reference: plain-JAX 1x1 conv
    y_ref = jnp.einsum("nchw,oc->nohw", x, weight.reshape(C_out, C_in)) \
            + bias.reshape(1, C_out, 1, 1)
    assert y.shape == (N, C_out, H, W)
    assert jnp.allclose(y, y_ref, atol=1e-5, rtol=1e-5)

    print("KERNEL_OK")
</pallas_src>

<mosaic_0001>
module attributes {stable_mosaic.version = 11 : i64} {
  func.func @_outconv_kernel(%arg0: i32, %arg1: i32, %arg2: memref<1x4x256xf32, #tpu.memory_space<vmem>>, %arg3: memref<3x4xf32, #tpu.memory_space<vmem>>, %arg4: memref<3x1xf32, #tpu.memory_space<vmem>>, %arg5: memref<1x3x256xf32, #tpu.memory_space<vmem>>) attributes {dimension_semantics = [#tpu.dimension_semantics<parallel>, #tpu.dimension_semantics<parallel>], iteration_bounds = array<i64: 2, 1>, scalar_prefetch = 0 : i64, scratch_operands = 0 : i64, tpu.core_type = #tpu.core_type<tc>, window_params = [{transform_indices = @transform_0, window_bounds = array<i64: 1, 4, 256>}, {pipeline_mode = #tpu.pipeline_mode<synchronous>, transform_indices = @transform_1, window_bounds = array<i64: 3, 4>}, {pipeline_mode = #tpu.pipeline_mode<synchronous>, transform_indices = @transform_2, window_bounds = array<i64: 3, 1>}, {transform_indices = @transform_3, window_bounds = array<i64: 1, 3, 256>}]} {
    %c0 = arith.constant 0 : index
    %c0_0 = arith.constant 0 : index
    %c0_1 = arith.constant 0 : index
    %0 = vector.load %arg2[%c0, %c0_0, %c0_1] : memref<1x4x256xf32, #tpu.memory_space<vmem>>, vector<1x4x256xf32>
    %c0_2 = arith.constant 0 : index
    %c0_3 = arith.constant 0 : index
    %1 = vector.load %arg3[%c0_2, %c0_3] : memref<3x4xf32, #tpu.memory_space<vmem>>, vector<3x4xf32>
    %c0_4 = arith.constant 0 : index
    %c0_5 = arith.constant 0 : index
    %2 = vector.load %arg4[%c0_4, %c0_5] : memref<3x1xf32, #tpu.memory_space<vmem>>, vector<3x1xf32>
    %3 = vector.shape_cast %2 : vector<3x1xf32> to vector<1x3x1xf32>
    %4 = vector.extract_strided_slice %1 {offsets = [0, 0], sizes = [3, 1], strides = [1, 1]} : vector<3x4xf32> to vector<3x1xf32>
    %5 = vector.shape_cast %4 : vector<3x1xf32> to vector<1x3x1xf32>
    %6 = vector.extract_strided_slice %0 {offsets = [0, 0, 0], sizes = [1, 1, 256], strides = [1, 1, 1]} : vector<1x4x256xf32> to vector<1x1x256xf32>
    %7 = vector.broadcast %5 : vector<1x3x1xf32> to vector<1x3x256xf32>
    %8 = vector.broadcast %6 : vector<1x1x256xf32> to vector<1x3x256xf32>
    %9 = arith.mulf %7, %8 : vector<1x3x256xf32>
    %10 = vector.broadcast %3 : vector<1x3x1xf32> to vector<1x3x256xf32>
    %11 = arith.addf %10, %9 : vector<1x3x256xf32>
    %12 = vector.extract_strided_slice %1 {offsets = [0, 1], sizes = [3, 1], strides = [1, 1]} : vector<3x4xf32> to vector<3x1xf32>
    %13 = vector.shape_cast %12 : vector<3x1xf32> to vector<1x3x1xf32>
    %14 = vector.extract_strided_slice %0 {offsets = [0, 1, 0], sizes = [1, 1, 256], strides = [1, 1, 1]} : vector<1x4x256xf32> to vector<1x1x256xf32>
    %15 = vector.broadcast %13 : vector<1x3x1xf32> to vector<1x3x256xf32>
    %16 = vector.broadcast %14 : vector<1x1x256xf32> to vector<1x3x256xf32>
    %17 = arith.mulf %15, %16 : vector<1x3x256xf32>
    %18 = arith.addf %11, %17 : vector<1x3x256xf32>
    %19 = vector.extract_strided_slice %1 {offsets = [0, 2], sizes = [3, 1], strides = [1, 1]} : vector<3x4xf32> to vector<3x1xf32>
    %20 = vector.shape_cast %19 : vector<3x1xf32> to vector<1x3x1xf32>
    %21 = vector.extract_strided_slice %0 {offsets = [0, 2, 0], sizes = [1, 1, 256], strides = [1, 1, 1]} : vector<1x4x256xf32> to vector<1x1x256xf32>
    %22 = vector.broadcast %20 : vector<1x3x1xf32> to vector<1x3x256xf32>
    %23 = vector.broadcast %21 : vector<1x1x256xf32> to vector<1x3x256xf32>
    %24 = arith.mulf %22, %23 : vector<1x3x256xf32>
    %25 = arith.addf %18, %24 : vector<1x3x256xf32>
    %26 = vector.extract_strided_slice %1 {offsets = [0, 3], sizes = [3, 1], strides = [1, 1]} : vector<3x4xf32> to vector<3x1xf32>
    %27 = vector.shape_cast %26 : vector<3x1xf32> to vector<1x3x1xf32>
    %28 = vector.extract_strided_slice %0 {offsets = [0, 3, 0], sizes = [1, 1, 256], strides = [1, 1, 1]} : vector<1x4x256xf32> to vector<1x1x256xf32>
    %29 = vector.broadcast %27 : vector<1x3x1xf32> to vector<1x3x256xf32>
    %30 = vector.broadcast %28 : vector<1x1x256xf32> to vector<1x3x256xf32>
    %31 = arith.mulf %29, %30 : vector<1x3x256xf32>
    %32 = arith.addf %25, %31 : vector<1x3x256xf32>
    %c0_6 = arith.constant 0 : index
    %c0_7 = arith.constant 0 : index
    %c0_8 = arith.constant 0 : index
    %33 = vector.load %arg5[%c0_6, %c0_7, %c0_8] : memref<1x3x256xf32, #tpu.memory_space<vmem>>, vector<1x3x256xf32>
    tpu.vector_store %arg5[%c0_6, %c0_7, %c0_8], %32 {strides = array<i32>} : memref<1x3x256xf32, #tpu.memory_space<vmem>>, vector<1x3x256xf32>,
    return
  }
  func.func @transform_0(%arg0: i32, %arg1: i32) -> (i32, i32, i32) {
    %c0_i32 = arith.constant 0 : i32
    %c0_i32_0 = arith.constant 0 : i32
    return %arg0, %c0_i32, %arg1 : i32, i32, i32
  }
  func.func @transform_1(%arg0: i32, %arg1: i32) -> (i32, i32) {
    %c0_i32 = arith.constant 0 : i32
    %c0_i32_0 = arith.constant 0 : i32
    %c0_i32_1 = arith.constant 0 : i32
    return %c0_i32, %c0_i32_0 : i32, i32
  }
  func.func @transform_2(%arg0: i32, %arg1: i32) -> (i32, i32) {
    %c0_i32 = arith.constant 0 : i32
    %c0_i32_0 = arith.constant 0 : i32
    %c0_i32_1 = arith.constant 0 : i32
    return %c0_i32, %c0_i32_0 : i32, i32
  }
  func.func @transform_3(%arg0: i32, %arg1: i32) -> (i32, i32, i32) {
    %c0_i32 = arith.constant 0 : i32
    %c0_i32_0 = arith.constant 0 : i32
    return %arg0, %c0_i32, %arg1 : i32, i32, i32
  }
}

</mosaic_0001>

<bundles_post_ra>
// kernel: tpu_custom_call.1
= control target key start
LH: loop header
LB: loop body
LE: loop exit
PB: predicated region body
PF: predicated region fallthrough
CT: control target
= control target key end

     0   :  { %8 = vsyncpa [#allocation3], 0  ;;  %s747_s0 = inlined_call_operand.hbm [shape: f32[2,4,256], index: 0, kind: input, shape index: {}]   ;;  %s748_s1 = inlined_call_operand.vmem [shape: f32[3,4], index: 1, kind: input, shape index: {}]   ;;  %s749_s2 = inlined_call_operand.vmem [shape: f32[3,1], index: 2, kind: input, shape index: {}]   ;;  %s750_s3 = inlined_call_operand.vmem [shape: f32[2,3,256], index: 3, kind: output, shape index: {}]  }
   0x1   :  { %10 = vsyncpa [#allocation3 + $0x1], 0  ;;  %s616_s12 = smov 0   ;;  %s618_s13 = smov 0  }
   0x2   :  { %s620_s14 = smov 0   ;;  %s622_s15 = smov 0  }
   0x3   :  { %s624_s16 = smov 0   ;;  %s626_s17 = smov 0  }
   0x4 LB: > { %s431_s18 = sadd.s32 4294967295, %s589_s17   ;;  %s28_s19 = sadd.s32 1, %s585_s16  ;;  %s589_s17 = sphi %s626_s17, %s16_s17   ;;  %s585_s16 = sphi %s624_s16, %s760_s16   ;;  %s581_s15 = sphi %s622_s15, %s759_s15   ;;  %s577_s14 = sphi %s620_s14, %s758_s14   ;;  %s573_s13 = sphi %s618_s13, %s757_s13   ;;  %s569_s12 = sphi %s616_s12, %s756_s12  }
   0x5   : > { %p30_p0 = scmp.ge.s32.totalorder %s28_s19, 2  ;;  %s37_s20 = sadd.s32 1, %s577_s14 }
   0x6   : > { %p44_p1 = scmp.ne.s32.totalorder %s577_s14, %s573_s13  ;;  %p45_p2 = scmp.eq.s32.totalorder %s589_s17, 0 }
   0x7   : > { %s762_s19 = smov (%p30_p0, %s28_s19), 0  ;;  %p50_p4 = scmp.ne.s32.totalorder %s573_s13, %s569_s12 }
   0x8   : > { %p652_p3 = por %p45_p2, %p44_p1  ;;  %s32_s22 = ssub.s32 %s585_s16, %s762_s19 }
   0x9   : > { %p51_p5 = scmp.eq.s32.totalorder %s431_s18, 0  ;;  %p35_p6 = scmp.eq.s32.totalorder %s32_s22, 0 }
   0xa   : > { %p452_p8 = scmp.lt.s32.totalorder %s589_s17, 2  ;;  %s150_s25 = sand.u32 1, %s577_s14  }
   0xb   : > { %p659_p7 = por %p51_p5, %p50_p4  ;;  %s444_s26 = sshll.u32 %s585_s16, 7 }
   0xc   : > { %s665_s24 = scalar_select %p35_p6, %s577_s14, %s37_s20  }
   0xd   : > { %s435_s27 = sshll.u32 %s150_s25, 3  ;;  %s672_s30 = scalar_lea.hbm %s747_s0, %s444_s26 }
   0xe   : > { %s154_s4 = scalar_lea.vmem [#allocation2], %s435_s27  ;;  %p676_p9 = pnand %p452_p8, %p652_p3 }
   0xf   : > { %s164_s5 = sshll.u32 %s154_s4, 4  ;;  %s151_s7 = scalar_lea.sflag [#allocation3], %s150_s25  ;;  %s680_s5 = int_to_ptr.vmem [resolvable:$true] %s164_s5 }
  0x10   : > { %s509_s8 = scalar_lea.hbm %s672_s30, 128  ;;  %p511_p13 = pneg %p676_p9 }
  0x11   : > { %p510_p12 = scmp.ne.s32.totalorder %s672_s30, %s509_s8  ;;  %s514_s11 = scalar_lea.hbm %s747_s0, 256 }
  0x12   : > { %p515_p2 = scmp.lt.u32.totalorder %s672_s30, %s747_s0  ;;  %p516_p3 = scmp.lt.u32.totalorder %s514_s11, %s509_s8 }
  0x13   : > { %p512_p0 = pnand %p511_p13, %p510_p12  ;;  %p518_p5 = scmp.lt.u32.totalorder %s509_s8, %s672_s30 }
  0x14   : > { %p517_p4 = por %p516_p3, %p515_p2 }
  0x15   : > { %p513_p1 = pneg %p512_p0 }
  0x16   : > { %p519_p6 = por %p518_p5, %p517_p4 }
  0x18   : > { %p520_p8 = pnand %p519_p6, %p513_p1 }
  0x1a   : > { %523 = shalt.err (!%p520_p8)
}
  0x1b   : > { %s524_s20 = scalar_lea.vmem %s680_s5, 128  ;;  %s591_s21 = smov [#allocation2]  }
  0x1c   : > { %p525_p12 = scmp.ne.s32.totalorder %s680_s5, %s524_s20  ;;  %s529_s22 = sshll.u32 %s591_s21, 4  ;;  %s530_s22 = int_to_ptr.vmem [resolvable:$false] %s529_s22 }
  0x1d   : > { %s531_s25 = scalar_lea.vmem %s530_s22, 256  ;;  %p532_p11 = scmp.lt.s32.totalorder %s680_s5, %s530_s22 }
  0x1e   : > { %p527_p0 = pnand %p525_p12, %p511_p13  ;;  %p533_p2 = scmp.lt.s32.totalorder %s531_s25, %s524_s20 }
  0x20   : > { %p528_p10 = pneg %p527_p0  ;;  %p534_p3 = por %p533_p2, %p532_p11 }
  0x22   : > { %p535_p4 = pnand %p534_p3, %p528_p10 }
  0x24   : > { %538 = shalt.err (!%p535_p4)
}
  0x25   : > { %451 = dma.hbm_to_vmem [thread:$0]  (!%p676_p9), %s672_s30, 128, %s680_s5, %s151_s7  }
  0x26   : > { %p754_p1 = scmp.lt.s32.totalorder %s589_s17, 3  ;;  %p755_p5 = scmp.ge.s32.totalorder %s589_s17, 1 }
  0x28   : > { %p170_p13 = pnand %p755_p5, %p754_p1 }
  0x29   : > { %s175_s26 = sand.u32 (!%p170_p13), 1, %s573_s13  }
  0x2a   : > { %173 = sbr.rel (%p170_p13) target bundleno = 196 (0xc4), region = 32  ;;  %s439_s27 = sshll.u32 (!%p170_p13), %s175_s26, 3 }
  0x2b   : > { %s176_s28 = scalar_lea.sflag (!%p170_p13), [#allocation3], %s175_s26  ;;  %s179_s29 = scalar_lea.vmem (!%p170_p13), [#allocation2], %s439_s27 }
  0x31   : > { %564 = dma.done.wait (%p659_p7), %s176_s28, 128  }
  0x32   : > { %566 = vsyncadd (%p659_p7), %s176_s28, 4294967168  ;;  %v592_v0 = vmov 0   ;;  %v593_v1 = vmov 1   ;;  %v218_v2 = vld [vmem:[%s748_s1] sm:$0x7]  ;;  %v594_v4 = vmov 2   ;;  %v226_v6 = vlaneseq }
  0x33   : > { %505 = vset.pattern.permute.xlu0 %v592_v0  ;;  %506 = vset.pattern.permute.xlu1 %v593_v1  ;;  %v219_v3 = vld [vmem:[%s749_s2] sm:$0x7]  ;;  %v595_v5 = vmov 3   ;;  %p208_p7 = scmp.lt.s32.totalorder %s581_s15, 1 }
  0x34   : > { %222 = vperm.xlu0 %505, %v218_v2   ;;  %254 = vperm.xlu1 %506, %v218_v2   ;;  %v227_v7 = vshrl.u32 %v226_v6, 7  ;;  %v217_v10 = vld [vmem:[%s179_s29] sm:$0xff] }
  0x35   : > { %s764_s15 = smov (!%p208_p7, %s581_s15), 1 }
  0x36   : > { %v228_v8 = vsub.s32 0, %v227_v7  ;;  %v232_v9 = vsub.s32 4, %v227_v7  ;;  %v259_v11 = vsub.s32 1, %v227_v7  ;;  %v263_v12 = vsub.s32 5, %v227_v7  ;;  %s445_s23 = sshll.u32 %s764_s15, 3 }
  0x37   : > { %v285_v13 = vsub.s32 2, %v227_v7  ;;  %v289_v14 = vsub.s32 6, %v227_v7  ;;  %v311_v21 = vsub.s32 3, %v227_v7  ;;  %v315_v22 = vsub.s32 7, %v227_v7  ;;  %s215_s9 = scalar_lea.vmem %s750_s3, %s445_s23 }
  0x38   : > { %248 = vperm.xlu0 %505, %v219_v3   ;;  %507 = vset.pattern.permute.xlu1 %v594_v4  ;;  %v229_v15 = vrot.slane %v217_v10, %v228_v8  ;;  %v233_v16 = vrot.slane %v217_v10, %v232_v9  ;;  %v260_v17 = vrot.slane %v217_v10, %v259_v11 }
  0x39   : > { %280 = vperm.xlu1 %507, %v218_v2   ;;  %v264_v18 = vrot.slane %v217_v10, %v263_v12  ;;  %v286_v19 = vrot.slane %v217_v10, %v285_v13  ;;  %v290_v20 = vrot.slane %v217_v10, %v289_v14  ;;  %v312_v31 = vrot.slane %v217_v10, %v311_v21 }
  0x3a   : > { %v239_v23 = vrot.slane %v229_v15, %v228_v8  ;;  %v243_v24 = vrot.slane %v233_v16, %v228_v8  ;;  %v270_v27 = vrot.slane %v260_v17, %v259_v11  ;;  %v316_v32 = vrot.slane %v217_v10, %v315_v22 }
  0x3b   : > { %v274_v28 = vrot.slane %v264_v18, %v259_v11  ;;  %v296_v29 = vrot.slane %v286_v19, %v285_v13  ;;  %v300_v30 = vrot.slane %v290_v20, %v285_v13  ;;  %v322_v43 = vrot.slane %v312_v31, %v311_v21 }
  0x3c   : > { %508 = vset.pattern.permute.xlu0 %v595_v5  ;;  %v326_v44 = vrot.slane %v316_v32, %v311_v21 }
  0x3d   : > { %306 = vperm.xlu0 %508, %v218_v2  }
  0xb3   : > { %v223_v25 = vpop.permute.xlu0 %222  ;;  %v255_v26 = vpop.permute.xlu1 %254 }
  0xb4   : > { %v244_v33 = vmul.f32 %v239_v23, %v223_v25  ;;  %v245_v34 = vmul.f32 %v243_v24, %v223_v25  ;;  %v275_v36 = vmul.f32 %v270_v27, %v255_v26  ;;  %v276_v37 = vmul.f32 %v274_v28, %v255_v26 }
  0xb7   : > { %v249_v35 = vpop.permute.xlu0 %248 }
  0xb8   : > { %v251_v38 = vadd.f32 %v249_v35, %v244_v33  ;;  %v252_v39 = vadd.f32 %v249_v35, %v245_v34  ;;  %v281_v40 = vpop.permute.xlu1 %280 }
  0xb9   : > { %v301_v41 = vmul.f32 %v296_v29, %v281_v40  ;;  %v302_v42 = vmul.f32 %v300_v30, %v281_v40 }
  0xba   : > { %v277_v45 = vadd.f32 %v275_v36, %v251_v38  ;;  %v278_v46 = vadd.f32 %v276_v37, %v252_v39 }
  0xbc   : > { %v303_v47 = vadd.f32 %v301_v41, %v277_v45  ;;  %v304_v48 = vadd.f32 %v302_v42, %v278_v46  ;;  %v307_v49 = vpop.permute.xlu0 %306 }
  0xbd   : > { %v327_v50 = vmul.f32 %v322_v43, %v307_v49  ;;  %v328_v51 = vmul.f32 %v326_v44, %v307_v49 }
  0xbf   : > { %v329_v52 = vadd.f32 %v327_v50, %v303_v47  ;;  %v330_v53 = vadd.f32 %v328_v51, %v304_v48 }
  0xc1   : > { %v333_v54 = vcombine.low %v329_v52, %v330_v53 }
  0xc3   : > { %335 = vst [vmem:[%s215_s9] sm:$0x77] %v333_v54 }
  0xc4 PF: > { %s16_s17 = sadd.s32 1, %s589_s17   ;;  %s756_s12 = smov %s573_s13 }
  0xc5   : > { %p13_p9 = scmp.ge.s32.totalorder %s16_s17, 4   ;;  %s757_s13 = smov %s577_s14 }
  0xc6   : > { %s758_s14 = smov %s665_s24  ;;  %s759_s15 = smov %s585_s16 }
  0xc7   : > { %s760_s16 = smov %s762_s19  ;;  %15 = sbr.rel (!%p13_p9) target bundleno = 4 (0x4), region = 72 }
  0xce   :  { %366 = vsyncpa [#allocation3], 1 }
  0xcf   :  { %368 = vsyncpa [#allocation3 + $0x1], 1 }

</bundles_post_ra>
